<compile_context>
chip_gen: v7x
topology: tpu7x:2x2x1
jax: 0.10.0
libtpu: 0.0.40
codegen_flags: <defaults>
</compile_context>

<pallas_src>
import functools

import jax
import jax.numpy as jnp
from jax.experimental import pallas as pl
from jax.experimental.pallas import tpu as pltpu


def _round_up(x: int, m: int) -> int:
    return ((x + m - 1) // m) * m


def _pick_tk(K: int, cap: int = 2048) -> int:
    """Pick the K tile: a multiple-of-128 divisor of K (no padding), or full K."""
    if K % 128 != 0:
        # Full-dim block is always legal (block dim == array dim); avoids any K pad.
        # TODO(synk): if a model ever ships a huge, non-128-aligned d_model, pad K once.
        return K
    tk = 128
    for cand in range(128, min(K, cap) + 1, 128):
        if K % cand == 0:
            tk = cand
    return tk


def _linear_kernel_accout(x_ref, w_ref, b_ref, o_ref, *, cast_lhs_bf16):
    """f32 output: accumulate directly into the resident output tile.

    x_ref: [tm, tk]  activations tile (original dtype; cast to bf16 in-register)
    w_ref: [tk, tn]  pre-transposed, pre-cast weight tile (lane-dense N)
    b_ref: [1,  tn]  f32 bias tile
    o_ref: [tm, tn]  f32 output tile, resident across the K grid axis
    """
    k = pl.program_id(2)

    @pl.when(k == 0)
    def _():
        o_ref[...] = jnp.broadcast_to(b_ref[...], o_ref.shape)

    x = x_ref[...]
    if cast_lhs_bf16:
        x = x.astype(jnp.bfloat16)
    o_ref[...] += jnp.dot(x, w_ref[...], preferred_element_type=jnp.float32)


def _linear_kernel_scratch(x_ref, w_ref, b_ref, o_ref, acc_ref, *, cast_lhs_bf16):
    """Non-f32 output: keep an f32 VMEM accumulator, cast once at the last K step."""
    k = pl.program_id(2)

    @pl.when(k == 0)
    def _():
        acc_ref[...] = jnp.broadcast_to(b_ref[...], acc_ref.shape)

    x = x_ref[...]
    if cast_lhs_bf16:
        x = x.astype(jnp.bfloat16)
    acc_ref[...] += jnp.dot(x, w_ref[...], preferred_element_type=jnp.float32)

    @pl.when(k == pl.num_programs(2) - 1)
    def _():
        o_ref[...] = acc_ref[...].astype(o_ref.dtype)


@functools.partial(jax.jit, static_argnames=("force_pallas", "use_bf16_matmul"))
def output_head_forward(encoder_output, weight, bias, *, force_pallas=False,
                        use_bf16_matmul=True):
    """span_logits = encoder_output @ weight.T + bias  (nn.Linear semantics).

    encoder_output: [batch, seq, d_model]
    weight:         [num_output, d_model]  (PyTorch layout)
    bias:           [num_output]
    returns:        [batch, seq, num_output]
    """
    batch, seq, d_model = encoder_output.shape
    num_output = weight.shape[0]
    M, K, N = batch * seq, d_model, num_output
    out_dtype = encoder_output.dtype

    # Tiny problems: per-pallas_call fixed cost dwarfs the math; let XLA fuse it.
    if not force_pallas and (M < 256 or N < 128):
        out = jnp.einsum("bsd,nd->bsn", encoder_output, weight) + bias
        return out.astype(out_dtype)

    # ---- hardware-aware budget -------------------------------------------------
    try:
        vmem_cap = int(pltpu.get_tpu_info().vmem_capacity_bytes)
    except Exception:
        vmem_cap = 64 * 1024 * 1024  # conservative (v7x per-TC)
    big_vmem = vmem_cap >= 100 * 1024 * 1024          # v5e / v6e (128 MiB)
    vmem_limit = int(vmem_cap * 3 // 4)               # ~96 MiB v5e/v6e, ~48 MiB v7x

    # ---- tile plan (no padding of the activation matrix) ------------------------
    tm_cap = 1024 if big_vmem else 512                # v7x: keep >=2 M tiles at M=1024
    tm = M if M <= tm_cap else tm_cap                 # full-dim block or mult-of-8 cap
    grid_m = pl.cdiv(M, tm)                           # ragged last M tile is masked

    tk = _pick_tk(K)                                  # divides K (or == K): no K pad
    grid_k = K // tk

    N_pad = _round_up(N, 128)                         # lane-dense output
    tn = N_pad if N_pad <= 512 else 512
    N_pad = _round_up(N_pad, tn)
    grid_n = N_pad // tn

    # ---- operand prep (only the small parameter tensors are touched) ------------
    x2d = encoder_output.reshape(M, K)                # no pad, no extra HBM copy

    w_dtype = jnp.bfloat16 if use_bf16_matmul else encoder_output.dtype
    # One-time [K, N_pad] layout + optional bf16 cast (parameter-sized; in a real
    # model this would be hoisted out of the per-step path entirely).
    w_kn = jnp.pad(weight.astype(w_dtype).T, ((0, 0), (0, N_pad - N)))
    b2d = jnp.pad(bias.astype(jnp.float32).reshape(1, N), ((0, 0), (0, N_pad - N)))

    grid = (grid_m, grid_n, grid_k)

    accumulate_in_out = out_dtype == jnp.float32
    if accumulate_in_out:
        kernel = functools.partial(_linear_kernel_accout, cast_lhs_bf16=use_bf16_matmul)
        scratch = []
    else:
        kernel = functools.partial(_linear_kernel_scratch, cast_lhs_bf16=use_bf16_matmul)
        scratch = [pltpu.VMEM((tm, tn), jnp.float32)]

    # Honest streaming estimate: x is re-read per N tile, w per M tile.
    x_item = jnp.dtype(encoder_output.dtype).itemsize
    w_item = jnp.dtype(w_dtype).itemsize
    bytes_accessed = int(M * K * x_item * grid_n
                         + K * N_pad * w_item * grid_m
                         + N_pad * 4 * grid_m
                         + M * N_pad * jnp.dtype(out_dtype).itemsize)

    # NOTE: if profiling shows exposed DMA on the x stream for 1-2 K-step shapes,
    # add pipeline_mode=pl.Buffered(3) to the x BlockSpec (VMEM headroom exists).
    out2d = pl.pallas_call(
        kernel,
        out_shape=jax.ShapeDtypeStruct((M, N_pad), out_dtype),
        grid_spec=pltpu.PrefetchScalarGridSpec(
            num_scalar_prefetch=0,
            grid=grid,
            in_specs=[
                pl.BlockSpec((tm, tk), lambda i, j, k: (i, k)),   # x  [M, K]
                pl.BlockSpec((tk, tn), lambda i, j, k: (k, j)),   # w  [K, N_pad]
                pl.BlockSpec((1, tn), lambda i, j, k: (0, j)),    # b  [1, N_pad]
            ],
            out_specs=pl.BlockSpec((tm, tn), lambda i, j, k: (i, j)),
            scratch_shapes=scratch,
        ),
        compiler_params=pltpu.CompilerParams(
            dimension_semantics=("parallel", "parallel", "arbitrary"),
            vmem_limit_bytes=vmem_limit,
        ),
        cost_estimate=pl.CostEstimate(
            flops=2 * M * K * N_pad,
            bytes_accessed=bytes_accessed,
            transcendentals=0),
    )(x2d, w_kn, b2d)

    return out2d[:, :N].reshape(batch, seq, num_output)


if __name__ == "__main__":
    key = jax.random.PRNGKey(0)
    k_x, k_w, k_b, k_x2, k_w2, k_b2 = jax.random.split(key, 6)

    # ---- Test 1: small shapes consistent with a sequence-labeling head ----------
    batch, seq, d_model, num_output = 2, 8, 32, 16
    bound = 1.0 / (d_model ** 0.5)
    encoder_output = jax.random.normal(k_x, (batch, seq, d_model), dtype=jnp.float32)
    weight = jax.random.uniform(k_w, (num_output, d_model),
                                minval=-bound, maxval=bound, dtype=jnp.float32)
    bias = jax.random.uniform(k_b, (num_output,),
                              minval=-bound, maxval=bound, dtype=jnp.float32)
    ref = encoder_output @ weight.T + bias

    # Exactness check: f32-operand Pallas path matches nn.Linear tightly.
    out_f32 = output_head_forward(encoder_output, weight, bias,
                                  force_pallas=True, use_bf16_matmul=False)
    jax.block_until_ready(out_f32)
    assert out_f32.shape == (batch, seq, num_output)
    assert jnp.allclose(out_f32, ref, atol=1e-4, rtol=1e-4), "f32-path mismatch"

    # Default fast path: bf16 operands, f32 accumulator (looser tolerance).
    out = output_head_forward(encoder_output, weight, bias, force_pallas=True)
    jax.block_until_ready(out)
    assert jnp.allclose(out, ref, atol=2e-2, rtol=2e-2), "bf16-path mismatch"

    # Auto-dispatch path (tiny shapes -> fused XLA dot) must agree too.
    out_auto = output_head_forward(encoder_output, weight, bias)
    assert jnp.allclose(out_auto, ref, atol=1e-4, rtol=1e-4), "fallback mismatch"

    # ---- Test 2: larger shapes exercising multi-tile M, padded N, full-K step ---
    b2, s2, d2, n2 = 2, 512, 1280, 200
    bound2 = 1.0 / (d2 ** 0.5)
    x_big = jax.random.normal(k_x2, (b2, s2, d2), dtype=jnp.float32)
    w_big = jax.random.uniform(k_w2, (n2, d2), minval=-bound2, maxval=bound2,
                               dtype=jnp.float32)
    bias_big = jax.random.uniform(k_b2, (n2,), minval=-bound2, maxval=bound2,
                                  dtype=jnp.float32)

    out_big = output_head_forward(x_big, w_big, bias_big, force_pallas=True)
    jax.block_until_ready(out_big)
    ref_big = x_big @ w_big.T + bias_big
    assert out_big.shape == (b2, s2, n2)
    assert jnp.allclose(out_big, ref_big, atol=3e-2, rtol=3e-2), "tiled-shape mismatch"

    print("KERNEL_OK")
</pallas_src>

<mosaic_0001>
module attributes {stable_mosaic.version = 11 : i64} {
  func.func @_linear_kernel_accout(%arg0: i32, %arg1: i32, %arg2: i32, %arg3: memref<16x32xf32, #tpu.memory_space<vmem>>, %arg4: memref<32x128xf32, #tpu.memory_space<vmem>>, %arg5: memref<1x128xf32, #tpu.memory_space<vmem>>, %arg6: memref<16x128xf32, #tpu.memory_space<vmem>>) attributes {dimension_semantics = [#tpu.dimension_semantics<parallel>, #tpu.dimension_semantics<parallel>, #tpu.dimension_semantics<arbitrary>], iteration_bounds = array<i64: 1, 1, 1>, scalar_prefetch = 0 : i64, scratch_operands = 0 : i64, tpu.core_type = #tpu.core_type<tc>, window_params = [{transform_indices = @transform_0, window_bounds = array<i64: 16, 32>}, {transform_indices = @transform_1, window_bounds = array<i64: 32, 128>}, {transform_indices = @transform_2, window_bounds = array<i64: 1, 128>}, {transform_indices = @transform_3, window_bounds = array<i64: 16, 128>}]} {
    %c0_i32 = arith.constant 0 : i32
    %0 = arith.cmpi eq, %arg2, %c0_i32 : i32
    %1 = arith.extui %0 : i1 to i32
    %c0_i32_0 = arith.constant 0 : i32
    %2 = arith.cmpi ne, %1, %c0_i32_0 : i32
    scf.if %2 {
      %c0_8 = arith.constant 0 : index
      %c0_9 = arith.constant 0 : index
      %9 = vector.load %arg5[%c0_8, %c0_9] : memref<1x128xf32, #tpu.memory_space<vmem>>, vector<1x128xf32>
      %10 = vector.shape_cast %9 : vector<1x128xf32> to vector<1x128xf32>
      %11 = vector.broadcast %10 : vector<1x128xf32> to vector<16x128xf32>
      %c0_10 = arith.constant 0 : index
      %c0_11 = arith.constant 0 : index
      %12 = vector.load %arg6[%c0_10, %c0_11] : memref<16x128xf32, #tpu.memory_space<vmem>>, vector<16x128xf32>
      tpu.vector_store %arg6[%c0_10, %c0_11], %11 {strides = array<i32>} : memref<16x128xf32, #tpu.memory_space<vmem>>, vector<16x128xf32>,
    } else {
    }
    %c0 = arith.constant 0 : index
    %c0_1 = arith.constant 0 : index
    %3 = vector.load %arg3[%c0, %c0_1] : memref<16x32xf32, #tpu.memory_space<vmem>>, vector<16x32xf32>
    %c0_2 = arith.constant 0 : index
    %c0_3 = arith.constant 0 : index
    %4 = vector.load %arg6[%c0_2, %c0_3] : memref<16x128xf32, #tpu.memory_space<vmem>>, vector<16x128xf32>
    %c0_4 = arith.constant 0 : index
    %c0_5 = arith.constant 0 : index
    %5 = vector.load %arg4[%c0_4, %c0_5] : memref<32x128xf32, #tpu.memory_space<vmem>>, vector<32x128xf32>
    %cst = arith.constant dense<0.000000e+00> : vector<16x128xf32>
    %6 = tpu.matmul %3, %5, %cst {dimension_numbers = #tpu.dot_dimension_numbers<[1], [0], [0], [1], [0, 0, 1, 1], [], []>} : vector<16x32xf32>, vector<32x128xf32>, vector<16x128xf32> -> vector<16x128xf32>
    %7 = arith.addf %4, %6 : vector<16x128xf32>
    %c0_6 = arith.constant 0 : index
    %c0_7 = arith.constant 0 : index
    %8 = vector.load %arg6[%c0_6, %c0_7] : memref<16x128xf32, #tpu.memory_space<vmem>>, vector<16x128xf32>
    tpu.vector_store %arg6[%c0_6, %c0_7], %7 {strides = array<i32>} : memref<16x128xf32, #tpu.memory_space<vmem>>, vector<16x128xf32>,
    return
  }
  func.func @transform_0(%arg0: i32, %arg1: i32, %arg2: i32) -> (i32, i32) {
    %c0_i32 = arith.constant 0 : i32
    return %arg0, %arg2 : i32, i32
  }
  func.func @transform_1(%arg0: i32, %arg1: i32, %arg2: i32) -> (i32, i32) {
    %c0_i32 = arith.constant 0 : i32
    return %arg2, %arg1 : i32, i32
  }
  func.func @transform_2(%arg0: i32, %arg1: i32, %arg2: i32) -> (i32, i32) {
    %c0_i32 = arith.constant 0 : i32
    %c0_i32_0 = arith.constant 0 : i32
    return %c0_i32, %arg1 : i32, i32
  }
  func.func @transform_3(%arg0: i32, %arg1: i32, %arg2: i32) -> (i32, i32) {
    %c0_i32 = arith.constant 0 : i32
    return %arg0, %arg1 : i32, i32
  }
}

</mosaic_0001>

<bundles_post_ra>
// kernel: output_head_forward.1
= control target key start
LH: loop header
LB: loop body
LE: loop exit
PB: predicated region body
PF: predicated region fallthrough
CT: control target
= control target key end

     0   :  { %vm35_vm0 = vcmask 261120   ;;  %s200_s1 = inlined_call_operand.vmem [shape: f32[32,128], index: 1, kind: input, shape index: {}]   ;;  %s201_s0 = inlined_call_operand.vmem [shape: f32[16,32], index: 0, kind: input, shape index: {}]   ;;  %s202_s2 = inlined_call_operand.vmem [shape: f32[1,128], index: 2, kind: input, shape index: {}]   ;;  %s203_s3 = inlined_call_operand.vmem [shape: f32[16,128], index: 3, kind: output, shape index: {}]  }
   0x1   :  { %v31_v0 = vld [vmem:[%s200_s1] sm:$0xff]  ;;  %v32_v1 = vld [vmem:[%s200_s1 + $0x8] sm:$0xff]  ;;  %v33_v2 = vld [vmem:[%s200_s1 + $0x10] sm:$0xff] }
   0x2   :  { %v145_v3 = vpack.c.bf16 %v32_v1, %v31_v0  ;;  %v34_v4 = vld [vmem:[%s200_s1 + $0x18] sm:$0xff]  ;;  %v27_v5 = vld [vmem:[%s201_s0] sm:$0xff]  ;;  %v28_v7 = vld [vmem:[%s201_s0 + $0x8] sm:$0xff] }
   0x3   :  { %v149_v6 = vpack.c.bf16 %v34_v4, %v33_v2  ;;  %142 = vmatprep.mubr.msk.f32.mxu0 %vm35_vm0, %v27_v5  ;;  %v125_v8 = vld [vmem:[%s202_s2] ss:$0 sm:$0xff] }
   0x4   :  { %146 = vmatprep.subr.bf16.mxu0 %v145_v3 }
   0x5   :  { %148 = vmatpush3.bf16.msra.mxu0 %v145_v3 }
   0x6   :  { %150 = vmatprep.subr.bf16.mxu0 %v149_v6 }
   0x9   :  { %152 = vmatpush3.bf16.msra.mxu0 %v149_v6 }
   0xc   :  { %143 = vmatmul.mubr.msk.f32.vlgmr.msra.gmra.mrb[0].mxu0 %vm35_vm0, %v28_v7 }
  0xdf   :  { %v144_v9 = vpop.f32.mrb[0].mxu0 }
  0xe0   :  { %v118_v10 = vadd.f32 %v144_v9, %v125_v8  ;;  %v108_v11 = vpop.f32.mrb[1].mxu0 }
  0xe1   :  { %v117_v12 = vadd.f32 %v125_v8, %v108_v11 }
  0xe2   :  { %120 = vst [vmem:[%s203_s3 + $0x8] sm:$0xff] %v118_v10 }
  0xe3   :  { %119 = vst [vmem:[%s203_s3] sm:$0xff] %v117_v12 }

</bundles_post_ra>
